<compile_context>
chip_gen: v6e
topology: v6e:2x2x1
jax: 0.10.0
libtpu: 0.0.40
codegen_flags: <defaults>
</compile_context>

<pallas_src>
import jax
import jax.numpy as jnp
from jax import lax
from jax.experimental import pallas as pl
from jax.experimental.pallas import tpu as pltpu


# ----------------------------- kernels --------------------------------------


def _prot_body(cls_ref, pos_ref, prot_ref, emb_out_ref):
    # cls_ref: (1,1,H)  pos_ref: (1,Lp+1,H)  prot_ref: (N,Lp,H)  emb_out_ref: (N,Lp+1,H)
    N, Lp, H = prot_ref.shape
    # Batch-invariant cls row: computed once, written once per batch row (no concat).
    cls_row = (cls_ref[...] + pos_ref[:, 0:1, :]).astype(emb_out_ref.dtype)    # (1,1,H)
    emb_out_ref[:, 0:1, :] = jnp.broadcast_to(cls_row, (N, 1, H))
    emb_out_ref[:, 1:, :] = (prot_ref[...] + pos_ref[:, 1:, :]).astype(emb_out_ref.dtype)


def _fused_embed_kernel(mol_ref, w_ref, b_ref, pe_mol_ref, cls_ref, pos_ref, prot_ref,
                        emb_out_ref, mol_out_ref):
    # ---- mol path: whole batch in ONE matmul --------------------------------
    # mol_ref: (N, Lm, H)  w_ref: (H, H) torch (out, in)  b_ref: (1,1,H)  pe_mol_ref: (1, Lm, H)
    N, Lm, H = mol_ref.shape
    m2 = mol_ref[...].reshape(N * Lm, H)               # collapse leading dims (layout no-op)
    y = lax.dot_general(
        m2, w_ref[...],
        dimension_numbers=(((1,), (1,)), ((), ())),    # x @ W^T without transposing W
        preferred_element_type=jnp.float32,
    )
    y = y.reshape(N, Lm, H) + b_ref[...] + pe_mol_ref[...]   # f32 VPU epilogue
    mol_out_ref[...] = y.astype(mol_out_ref.dtype)

    # ---- prot path -----------------------------------------------------------
    _prot_body(cls_ref, pos_ref, prot_ref, emb_out_ref)


def _prot_only_kernel(cls_ref, pos_ref, prot_ref, emb_out_ref):
    _prot_body(cls_ref, pos_ref, prot_ref, emb_out_ref)


# ----------------------------- wrapper ---------------------------------------


def _full_spec(shape):
    # Whole-array block (block == array dims waives the (8,128) constraint).
    return pl.BlockSpec(tuple(shape), lambda i: (0,) * len(shape))


def embeddings_forward(params, prot, mol):
    """Replicates Embeddings.forward(prot, mol) -> (embeddings, mol_embeddings)."""
    N, Lp, H = prot.shape
    cls_token = params["cls_token"]                     # (1, 1, H)
    pos = params["position_embedding"]                  # (1, Lp+1, H)
    emb_shape = (N, Lp + 1, H)

    if mol is None:
        emb = pl.pallas_call(
            _prot_only_kernel,
            out_shape=jax.ShapeDtypeStruct(emb_shape, prot.dtype),
            grid_spec=pltpu.PrefetchScalarGridSpec(
                num_scalar_prefetch=0,
                grid=(1,),
                in_specs=[_full_spec(cls_token.shape), _full_spec(pos.shape),
                          _full_spec(prot.shape)],
                out_specs=_full_spec(emb_shape),
            ),
            compiler_params=pltpu.CompilerParams(dimension_semantics=("arbitrary",)),
            cost_estimate=pl.CostEstimate(
                flops=2 * N * (Lp + 1) * H,
                transcendentals=0,
                bytes_accessed=int(4 * (cls_token.size + pos.size + prot.size
                                        + N * (Lp + 1) * H)),
            ),
        )(cls_token, pos, prot)
        return emb, None

    Nm, Lm, Hm = mol.shape
    w = params["mol_w"]                                 # (H, H) torch (out, in); NOT transposed
    b = params["mol_b"].reshape(1, 1, Hm)               # rank-matched broadcast
    pe_mol = params["pe_mol"]                           # (1, Lm, H)

    flops = 2 * Nm * Lm * Hm * Hm + 3 * Nm * Lm * Hm + 2 * N * (Lp + 1) * H
    bytes_accessed = int(4 * (mol.size + w.size + b.size + pe_mol.size
                              + cls_token.size + pos.size + prot.size
                              + N * (Lp + 1) * H + Nm * Lm * Hm))

    emb, mol_emb = pl.pallas_call(
        _fused_embed_kernel,
        out_shape=(
            jax.ShapeDtypeStruct(emb_shape, prot.dtype),
            jax.ShapeDtypeStruct((Nm, Lm, Hm), mol.dtype),
        ),
        grid_spec=pltpu.PrefetchScalarGridSpec(
            num_scalar_prefetch=0,
            grid=(1,),
            in_specs=[
                _full_spec(mol.shape), _full_spec(w.shape), _full_spec(b.shape),
                _full_spec(pe_mol.shape), _full_spec(cls_token.shape),
                _full_spec(pos.shape), _full_spec(prot.shape),
            ],
            out_specs=(_full_spec(emb_shape), _full_spec((Nm, Lm, Hm))),
        ),
        compiler_params=pltpu.CompilerParams(dimension_semantics=("arbitrary",)),
        cost_estimate=pl.CostEstimate(
            flops=flops, transcendentals=0, bytes_accessed=bytes_accessed),
    )(mol, w, b, pe_mol, cls_token, pos, prot)
    return emb, mol_emb


# ----------------------------- main -----------------------------------------


if __name__ == "__main__":
    # Small shapes consistent with the module: hidden=32, feat_len=8, mol_len=8, batch=2.
    N, FEAT_LEN, MOL_LEN, H = 2, 8, 8, 32
    key = jax.random.PRNGKey(0)
    k_prot, k_mol, k_w, k_b, k_cls, k_pos, k_pem = jax.random.split(key, 7)

    params = {
        "cls_token": 0.1 * jax.random.normal(k_cls, (1, 1, H), jnp.float32),
        "position_embedding": 0.1 * jax.random.normal(k_pos, (1, FEAT_LEN + 1, H), jnp.float32),
        "pe_mol": 0.1 * jax.random.normal(k_pem, (1, MOL_LEN, H), jnp.float32),
        "mol_w": 0.1 * jax.random.normal(k_w, (H, H), jnp.float32),   # torch Linear weight (out, in)
        "mol_b": 0.1 * jax.random.normal(k_b, (H,), jnp.float32),
    }

    prot = jax.random.normal(k_prot, (N, FEAT_LEN, H), jnp.float32)
    mol = jax.random.normal(k_mol, (N, MOL_LEN, H), jnp.float32)

    emb, mol_emb = embeddings_forward(params, prot, mol)
    jax.block_until_ready(emb)
    jax.block_until_ready(mol_emb)

    # mol=None branch.
    emb_none, mol_none = embeddings_forward(params, prot, None)
    jax.block_until_ready(emb_none)

    # Pure-JAX reference check.
    ref_mol = mol @ params["mol_w"].T + params["mol_b"] + params["pe_mol"]
    cls_tok = jnp.broadcast_to(params["cls_token"], (N, 1, H))
    ref_emb = jnp.concatenate([cls_tok, prot], axis=1) + params["position_embedding"]

    assert emb.shape == (N, FEAT_LEN + 1, H) and mol_emb.shape == (N, MOL_LEN, H)
    assert mol_none is None
    assert jnp.allclose(emb, ref_emb, atol=1e-5), "prot embedding mismatch"
    assert jnp.allclose(emb_none, ref_emb, atol=1e-5), "prot-only embedding mismatch"
    assert jnp.allclose(mol_emb, ref_mol, atol=1e-5), "mol embedding mismatch"

    print("KERNEL_OK")
</pallas_src>

<mosaic_0001>
module attributes {stable_mosaic.version = 11 : i64} {
  func.func @_fused_embed_kernel(%arg0: i32, %arg1: memref<2x8x32xf32, #tpu.memory_space<vmem>>, %arg2: memref<32x32xf32, #tpu.memory_space<vmem>>, %arg3: memref<1x1x32xf32, #tpu.memory_space<vmem>>, %arg4: memref<1x8x32xf32, #tpu.memory_space<vmem>>, %arg5: memref<1x1x32xf32, #tpu.memory_space<vmem>>, %arg6: memref<1x9x32xf32, #tpu.memory_space<vmem>>, %arg7: memref<2x8x32xf32, #tpu.memory_space<vmem>>, %arg8: memref<2x9x32xf32, #tpu.memory_space<vmem>>, %arg9: memref<2x8x32xf32, #tpu.memory_space<vmem>>) attributes {dimension_semantics = [#tpu.dimension_semantics<arbitrary>], iteration_bounds = array<i64: 1>, scalar_prefetch = 0 : i64, scratch_operands = 0 : i64, tpu.core_type = #tpu.core_type<tc>, window_params = [{pipeline_mode = #tpu.pipeline_mode<synchronous>, transform_indices = @transform_0, window_bounds = array<i64: 2, 8, 32>}, {pipeline_mode = #tpu.pipeline_mode<synchronous>, transform_indices = @transform_1, window_bounds = array<i64: 32, 32>}, {pipeline_mode = #tpu.pipeline_mode<synchronous>, transform_indices = @transform_2, window_bounds = array<i64: 1, 1, 32>}, {pipeline_mode = #tpu.pipeline_mode<synchronous>, transform_indices = @transform_3, window_bounds = array<i64: 1, 8, 32>}, {pipeline_mode = #tpu.pipeline_mode<synchronous>, transform_indices = @transform_4, window_bounds = array<i64: 1, 1, 32>}, {pipeline_mode = #tpu.pipeline_mode<synchronous>, transform_indices = @transform_5, window_bounds = array<i64: 1, 9, 32>}, {pipeline_mode = #tpu.pipeline_mode<synchronous>, transform_indices = @transform_6, window_bounds = array<i64: 2, 8, 32>}, {pipeline_mode = #tpu.pipeline_mode<synchronous>, transform_indices = @transform_7, window_bounds = array<i64: 2, 9, 32>}, {pipeline_mode = #tpu.pipeline_mode<synchronous>, transform_indices = @transform_8, window_bounds = array<i64: 2, 8, 32>}]} {
    %c0 = arith.constant 0 : index
    %c0_0 = arith.constant 0 : index
    %c0_1 = arith.constant 0 : index
    %0 = vector.load %arg1[%c0, %c0_0, %c0_1] : memref<2x8x32xf32, #tpu.memory_space<vmem>>, vector<2x8x32xf32>
    %1 = vector.shape_cast %0 : vector<2x8x32xf32> to vector<16x32xf32>
    %c0_2 = arith.constant 0 : index
    %c0_3 = arith.constant 0 : index
    %2 = vector.load %arg2[%c0_2, %c0_3] : memref<32x32xf32, #tpu.memory_space<vmem>>, vector<32x32xf32>
    %cst = arith.constant dense<0.000000e+00> : vector<16x32xf32>
    %3 = tpu.matmul %1, %2, %cst {dimension_numbers = #tpu.dot_dimension_numbers<[1], [1], [0], [0], [0, 0, 1, 0], [], []>} : vector<16x32xf32>, vector<32x32xf32>, vector<16x32xf32> -> vector<16x32xf32>
    %4 = vector.shape_cast %3 : vector<16x32xf32> to vector<2x8x32xf32>
    %c0_4 = arith.constant 0 : index
    %c0_5 = arith.constant 0 : index
    %c0_6 = arith.constant 0 : index
    %5 = vector.load %arg3[%c0_4, %c0_5, %c0_6] : memref<1x1x32xf32, #tpu.memory_space<vmem>>, vector<1x1x32xf32>
    %6 = vector.broadcast %5 : vector<1x1x32xf32> to vector<2x8x32xf32>
    %7 = arith.addf %4, %6 : vector<2x8x32xf32>
    %c0_7 = arith.constant 0 : index
    %c0_8 = arith.constant 0 : index
    %c0_9 = arith.constant 0 : index
    %8 = vector.load %arg4[%c0_7, %c0_8, %c0_9] : memref<1x8x32xf32, #tpu.memory_space<vmem>>, vector<1x8x32xf32>
    %9 = vector.broadcast %8 : vector<1x8x32xf32> to vector<2x8x32xf32>
    %10 = arith.addf %7, %9 : vector<2x8x32xf32>
    %c0_10 = arith.constant 0 : index
    %c0_11 = arith.constant 0 : index
    %c0_12 = arith.constant 0 : index
    %11 = vector.load %arg9[%c0_10, %c0_11, %c0_12] : memref<2x8x32xf32, #tpu.memory_space<vmem>>, vector<2x8x32xf32>
    tpu.vector_store %arg9[%c0_10, %c0_11, %c0_12], %10 {strides = array<i32>} : memref<2x8x32xf32, #tpu.memory_space<vmem>>, vector<2x8x32xf32>,
    %c0_13 = arith.constant 0 : index
    %c0_14 = arith.constant 0 : index
    %c0_15 = arith.constant 0 : index
    %12 = vector.load %arg5[%c0_13, %c0_14, %c0_15] : memref<1x1x32xf32, #tpu.memory_space<vmem>>, vector<1x1x32xf32>
    %c0_16 = arith.constant 0 : index
    %c0_17 = arith.constant 0 : index
    %c0_18 = arith.constant 0 : index
    %13 = vector.load %arg6[%c0_16, %c0_17, %c0_18] : memref<1x9x32xf32, #tpu.memory_space<vmem>>, vector<1x1x32xf32>
    %14 = arith.addf %12, %13 : vector<1x1x32xf32>
    %15 = vector.shape_cast %14 : vector<1x1x32xf32> to vector<1x1x32xf32>
    %16 = vector.broadcast %15 : vector<1x1x32xf32> to vector<2x1x32xf32>
    %c0_19 = arith.constant 0 : index
    %c0_20 = arith.constant 0 : index
    %c0_21 = arith.constant 0 : index
    %17 = vector.load %arg8[%c0_19, %c0_20, %c0_21] : memref<2x9x32xf32, #tpu.memory_space<vmem>>, vector<2x1x32xf32>
    tpu.vector_store %arg8[%c0_19, %c0_20, %c0_21], %16 {strides = array<i32>} : memref<2x9x32xf32, #tpu.memory_space<vmem>>, vector<2x1x32xf32>,
    %c0_22 = arith.constant 0 : index
    %c0_23 = arith.constant 0 : index
    %c0_24 = arith.constant 0 : index
    %18 = vector.load %arg7[%c0_22, %c0_23, %c0_24] : memref<2x8x32xf32, #tpu.memory_space<vmem>>, vector<2x8x32xf32>
    %c0_25 = arith.constant 0 : index
    %c1 = arith.constant 1 : index
    %c0_26 = arith.constant 0 : index
    %19 = vector.load %arg6[%c0_25, %c1, %c0_26] : memref<1x9x32xf32, #tpu.memory_space<vmem>>, vector<1x8x32xf32>
    %20 = vector.broadcast %19 : vector<1x8x32xf32> to vector<2x8x32xf32>
    %21 = arith.addf %18, %20 : vector<2x8x32xf32>
    %c0_27 = arith.constant 0 : index
    %c1_28 = arith.constant 1 : index
    %c0_29 = arith.constant 0 : index
    %22 = vector.load %arg8[%c0_27, %c1_28, %c0_29] : memref<2x9x32xf32, #tpu.memory_space<vmem>>, vector<2x8x32xf32>
    tpu.vector_store %arg8[%c0_27, %c1_28, %c0_29], %21 {strides = array<i32>} : memref<2x9x32xf32, #tpu.memory_space<vmem>>, vector<2x8x32xf32>,
    return
  }
  func.func @transform_0(%arg0: i32) -> (i32, i32, i32) {
    %c0_i32 = arith.constant 0 : i32
    %c0_i32_0 = arith.constant 0 : i32
    %c0_i32_1 = arith.constant 0 : i32
    %c0_i32_2 = arith.constant 0 : i32
    return %c0_i32, %c0_i32_0, %c0_i32_1 : i32, i32, i32
  }
  func.func @transform_1(%arg0: i32) -> (i32, i32) {
    %c0_i32 = arith.constant 0 : i32
    %c0_i32_0 = arith.constant 0 : i32
    %c0_i32_1 = arith.constant 0 : i32
    return %c0_i32, %c0_i32_0 : i32, i32
  }
  func.func @transform_2(%arg0: i32) -> (i32, i32, i32) {
    %c0_i32 = arith.constant 0 : i32
    %c0_i32_0 = arith.constant 0 : i32
    %c0_i32_1 = arith.constant 0 : i32
    %c0_i32_2 = arith.constant 0 : i32
    return %c0_i32, %c0_i32_0, %c0_i32_1 : i32, i32, i32
  }
  func.func @transform_3(%arg0: i32) -> (i32, i32, i32) {
    %c0_i32 = arith.constant 0 : i32
    %c0_i32_0 = arith.constant 0 : i32
    %c0_i32_1 = arith.constant 0 : i32
    %c0_i32_2 = arith.constant 0 : i32
    return %c0_i32, %c0_i32_0, %c0_i32_1 : i32, i32, i32
  }
  func.func @transform_4(%arg0: i32) -> (i32, i32, i32) {
    %c0_i32 = arith.constant 0 : i32
    %c0_i32_0 = arith.constant 0 : i32
    %c0_i32_1 = arith.constant 0 : i32
    %c0_i32_2 = arith.constant 0 : i32
    return %c0_i32, %c0_i32_0, %c0_i32_1 : i32, i32, i32
  }
  func.func @transform_5(%arg0: i32) -> (i32, i32, i32) {
    %c0_i32 = arith.constant 0 : i32
    %c0_i32_0 = arith.constant 0 : i32
    %c0_i32_1 = arith.constant 0 : i32
    %c0_i32_2 = arith.constant 0 : i32
    return %c0_i32, %c0_i32_0, %c0_i32_1 : i32, i32, i32
  }
  func.func @transform_6(%arg0: i32) -> (i32, i32, i32) {
    %c0_i32 = arith.constant 0 : i32
    %c0_i32_0 = arith.constant 0 : i32
    %c0_i32_1 = arith.constant 0 : i32
    %c0_i32_2 = arith.constant 0 : i32
    return %c0_i32, %c0_i32_0, %c0_i32_1 : i32, i32, i32
  }
  func.func @transform_7(%arg0: i32) -> (i32, i32, i32) {
    %c0_i32 = arith.constant 0 : i32
    %c0_i32_0 = arith.constant 0 : i32
    %c0_i32_1 = arith.constant 0 : i32
    %c0_i32_2 = arith.constant 0 : i32
    return %c0_i32, %c0_i32_0, %c0_i32_1 : i32, i32, i32
  }
  func.func @transform_8(%arg0: i32) -> (i32, i32, i32) {
    %c0_i32 = arith.constant 0 : i32
    %c0_i32_0 = arith.constant 0 : i32
    %c0_i32_1 = arith.constant 0 : i32
    %c0_i32_2 = arith.constant 0 : i32
    return %c0_i32, %c0_i32_0, %c0_i32_1 : i32, i32, i32
  }
}

</mosaic_0001>

<bundles_post_ra>
// kernel: tpu_custom_call.1
= control target key start
LH: loop header
LB: loop body
LE: loop exit
PB: predicated region body
PF: predicated region fallthrough
CT: control target
= control target key end

     0   :  { %14 = vsyncpa [#allocation3], 0  ;;  %s484_s0 = inlined_call_operand.vmem [shape: f32[2,8,32], index: 0, kind: input, shape index: {}]   ;;  %s485_s1 = inlined_call_operand.hbm [shape: f32[32,32], index: 1, kind: input, shape index: {}]   ;;  %s486_s2 = inlined_call_operand.hbm [shape: f32[1,1,32], index: 2, kind: input, shape index: {}]   ;;  %s487_s3 = inlined_call_operand.hbm [shape: f32[1,8,32], index: 3, kind: input, shape index: {}]   ;;  %s488_s4 = inlined_call_operand.hbm [shape: f32[1,1,32], index: 4, kind: input, shape index: {}]   ;;  %s489_s5 = inlined_call_operand.vmem [shape: f32[1,9,32], index: 5, kind: input, shape index: {}]   ;;  %s490_s6 = inlined_call_operand.vmem [shape: f32[2,8,32], index: 6, kind: input, shape index: {}]   ;;  %s491_s7 = inlined_call_operand.vmem [shape: f32[2,9,32], index: 7, kind: output, shape index: {0}]   ;;  %s492_s8 = inlined_call_operand.hbm [shape: f32[2,8,32], index: 8, kind: output, shape index: {1}]  }
   0x1   :  { %15 = vsyncpa [#allocation6], 0 }
   0x2   :  { %16 = vsyncpa [#allocation9], 0 }
   0x3   :  { %17 = vsyncpa [#allocation4], 0  ;;  %s367_s27 = smov [#allocation5]   ;;  %s368_s29 = smov [#allocation2]  }
   0x4   :  { %s38_s28 = sshll.u32 %s367_s27, 4  ;;  %s25_s30 = sshll.u32 %s368_s29, 4  ;;  %s39_s28 = int_to_ptr.vmem [resolvable:$true] %s38_s28  ;;  %s26_s30 = int_to_ptr.vmem [resolvable:$true] %s25_s30 }
   0x5   :  { %s267_s9 = scalar_lea.vmem %s39_s28, 16  ;;  %s271_s10 = scalar_lea.vmem %s39_s28, 32 }
   0x6   :  { %p268_p0 = scmp.ne.s32.totalorder %s39_s28, %s267_s9  ;;  %p272_p1 = scmp.lt.s32.totalorder %s39_s28, %s39_s28 }
   0x7   :  { %p273_p2 = scmp.lt.s32.totalorder %s271_s10, %s267_s9 }
   0x9   :  { %p274_p3 = por %p273_p2, %p272_p1 }
   0xb   :  { %p275_p4 = pnand %p274_p3, %p268_p0 }
   0xd   :  { %278 = shalt.err (!%p275_p4)
}
   0xe   :  { %41 = dma.hbm_to_vmem [thread:$0]  %s486_s2, 16, %s39_s28, [#allocation6]  }
   0xf   :  { %s287_s13 = scalar_lea.vmem %s26_s30, 512  ;;  %p292_p6 = scmp.lt.s32.totalorder %s26_s30, %s26_s30 }
  0x10   :  { %p288_p5 = scmp.ne.s32.totalorder %s26_s30, %s287_s13  ;;  %p293_p7 = scmp.lt.s32.totalorder %s287_s13, %s287_s13 }
  0x12   :  { %p294_p8 = por %p293_p7, %p292_p6 }
  0x14   :  { %p295_p9 = pnand %p294_p8, %p288_p5 }
  0x16   :  { %298 = shalt.err (!%p295_p9)
}
  0x17   :  { %s369_s14 = smov 128   ;;  %s370_s15 = smov 8  }
  0x18   :  { %31 = dma.hbm_to_vmem [thread:$0]  %s485_s1, 512, %s26_s30, [#allocation3], %s369_s14, %s369_s14, %s370_s15  }
  0x19   :  { %s371_s18 = smov [#allocation7]   ;;  %s372_s20 = smov [#allocation8]  }
  0x1a   :  { %s48_s19 = sshll.u32 %s371_s18, 4  ;;  %s58_s2 = sshll.u32 %s372_s20, 4  ;;  %s49_s19 = int_to_ptr.vmem [resolvable:$true] %s48_s19  ;;  %s59_s2 = int_to_ptr.vmem [resolvable:$true] %s58_s2 }
  0x1b   :  { %s307_s21 = scalar_lea.vmem %s49_s19, 128  ;;  %p312_p11 = scmp.lt.s32.totalorder %s49_s19, %s49_s19 }
  0x1c   :  { %p308_p10 = scmp.ne.s32.totalorder %s49_s19, %s307_s21  ;;  %p313_p12 = scmp.lt.s32.totalorder %s307_s21, %s307_s21 }
  0x1e   :  { %p314_p13 = por %p313_p12, %p312_p11 }
  0x20   :  { %p315_p0 = pnand %p314_p13, %p308_p10 }
  0x22   :  { %318 = shalt.err (!%p315_p0)
}
  0x23   :  { %51 = dma.hbm_to_vmem [thread:$0]  %s487_s3, 128, %s49_s19, [#allocation6]  }
  0x24   :  { %s327_s24 = scalar_lea.vmem %s59_s2, 16  ;;  %s331_s1 = scalar_lea.vmem %s59_s2, 32 }
  0x25   :  { %p328_p1 = scmp.ne.s32.totalorder %s59_s2, %s327_s24  ;;  %p332_p2 = scmp.lt.s32.totalorder %s59_s2, %s59_s2 }
  0x26   :  { %p333_p3 = scmp.lt.s32.totalorder %s331_s1, %s327_s24 }
  0x28   :  { %p334_p4 = por %p333_p3, %p332_p2 }
  0x2a   :  { %p335_p5 = pnand %p334_p4, %p328_p1 }
  0x2c   :  { %338 = shalt.err (!%p335_p5)
}
  0x2d   :  { %61 = dma.hbm_to_vmem [thread:$0]  %s488_s4, 16, %s59_s2, [#allocation9]  }
  0x2e   :  { %359 = dma.done.wait [#allocation3], 512  }
  0x2f   :  { %360 = vsyncadd [#allocation3], 4294966784 }
  0x30   :  { %361 = dma.done.wait [#allocation6], 144  }
  0x31   :  { %362 = vsyncadd [#allocation6], 4294967152 }
  0x32   :  { %363 = dma.done.wait [#allocation9], 16  }
  0x33   :  { %364 = vsyncadd [#allocation9], 4294967280  ;;  %vm84_vm0 = vcmask 261120   ;;  %v192_v0 = vld [vmem:[#allocation8] sm:$0x1]  ;;  %vm195_vm1 = vcmask 253952  }
  0x34   :  { %v193_v1 = vld [vmem:[%s489_s5] sm:$0x1]  ;;  %v83_v2 = vld [vmem:[#allocation2 + $0x18] sm:$0xff]  ;;  %v199_v5 = vld [vmem:[%s490_s6 + $0x8] sm:$0xff] }
  0x35   :  { %v194_v3 = vadd.f32 %v193_v1, %v192_v0  ;;  %241 = vmatprep.subr.msk.mxu0 %vm84_vm0, %v83_v2  ;;  %v198_v4 = vld [vmem:[%s490_s6] sm:$0xff]  ;;  %v82_v9 = vld [vmem:[#allocation2 + $0x10] sm:$0xff]  ;;  %v81_v11 = vld [vmem:[#allocation2 + $0x8] sm:$0xff] }
  0x36   :  { %v200_v6 = vld [vmem:[%s489_s5 + $0x1] sm:$0xff]  ;;  %242 = vmatpush3.xpose.msk.msra.mxu0 %vm84_vm0, %v83_v2  ;;  %v234_v14 = vld [vmem:[#allocation5] ss:$0 sm:$0xff] }
  0x37   :  { %v201_v7 = vadd.f32 %v200_v6, %v198_v4  ;;  %v202_v8 = vadd.f32 %v200_v6, %v199_v5  ;;  %196 = vst.msk [vmem:[%s491_s7] sm:$0x1] %vm195_vm1, %v194_v3  ;;  %197 = vst.msk [vmem:[%s491_s7 + $0x10] sm:$0x1] %vm195_vm1, %v194_v3  ;;  %243 = vmatprep.subr.msk.mxu0 %vm84_vm0, %v82_v9  ;;  %v78_v10 = vld [vmem:[%s484_s0] sm:$0xff]  ;;  %v79_v13 = vld [vmem:[%s484_s0 + $0x8] sm:$0xff] }
  0x38   :  { %249 = vmatprep.mubr.msk.f32.mxu0 %vm84_vm0, %v78_v10  ;;  %v80_v12 = vld [vmem:[#allocation2] sm:$0xff] }
  0x39   :  { %203 = vst.msk [vmem:[%s491_s7 + $0x1] sm:$0xff] %vm84_vm0, %v201_v7  ;;  %204 = vst.msk [vmem:[%s491_s7 + $0x11] sm:$0xff] %vm84_vm0, %v202_v8  ;;  %v187_v16 = vld [vmem:[#allocation7] sm:$0xff]  ;;  %s373_s7 = smov [#allocation10]  }
  0x3a   :  { %244 = vmatpush3.xpose.msk.msra.mxu0 %vm84_vm0, %v82_v9  ;;  %s212_s22 = sshll.u32 %s373_s7, 4  ;;  %s213_s22 = int_to_ptr.vmem [resolvable:$true] %s212_s22 }
  0x3b   :  { %245 = vmatprep.subr.msk.mxu0 %vm84_vm0, %v81_v11  ;;  %s339_s23 = scalar_lea.vmem %s213_s22, 256  ;;  %p344_p7 = scmp.lt.s32.totalorder %s213_s22, %s213_s22 }
  0x3c   :  { %p340_p6 = scmp.ne.s32.totalorder %s213_s22, %s339_s23  ;;  %p345_p8 = scmp.lt.s32.totalorder %s339_s23, %s339_s23 }
  0x3e   :  { %246 = vmatpush3.xpose.msk.msra.mxu0 %vm84_vm0, %v81_v11  ;;  %p346_p9 = por %p345_p8, %p344_p7 }
  0x3f   :  { %247 = vmatprep.subr.msk.mxu0 %vm84_vm0, %v80_v12 }
  0x40   :  { %p347_p10 = pnand %p346_p9, %p340_p6 }
  0x42   :  { %248 = vmatpush3.xpose.msk.msra.mxu0 %vm84_vm0, %v80_v12 }
  0x45   :  { %250 = vmatmul.mubr.msk.f32.vlgmr.msra.gmra.mxu0 %vm84_vm0, %v79_v13 }
 0x105   :  { %v251_v15 = vpop.f32.mrf.mxu0 }
 0x106   :  { %v186_v17 = vadd.f32 %v251_v15, %v234_v14 }
 0x107   :  { %v169_v18 = vpop.f32.mrf.mxu0 }
 0x108   :  { %v189_v19 = vadd.f32 %v187_v16, %v186_v17  ;;  %v185_v20 = vadd.f32 %v234_v14, %v169_v18 }
 0x10a   :  { %191 = vst.msk [vmem:[#allocation10 + $0x8] sm:$0xff] %vm84_vm0, %v189_v19  ;;  %v188_v21 = vadd.f32 %v187_v16, %v185_v20 }
 0x10c   :  { %190 = vst.msk [vmem:[#allocation10] sm:$0xff] %vm84_vm0, %v188_v21 }
 0x10d   :  { %350 = shalt.err (!%p347_p10)
}
 0x10e   :  { %218 = dma.vmem_to_hbm [thread:$0]  %s213_s22, 256, %s492_s8, [#allocation4], %s369_s14, %s369_s14, %s370_s15  }
 0x10f   :  { %365 = dma.done.wait [#allocation4], 256  }
 0x110   :  { %366 = vsyncadd [#allocation4], 4294967040 }
 0x111   :  { %224 = vsyncpa [#allocation3], 1 }
 0x112   :  { %225 = vsyncpa [#allocation6], 1 }
 0x113   :  { %226 = vsyncpa [#allocation9], 1 }
 0x114   :  { %227 = vsyncpa [#allocation4], 1 }

</bundles_post_ra>
